<compile_context>
chip_gen: v7x
topology: tpu7x:2x2x1
jax: 0.10.0
libtpu: 0.0.40
codegen_flags: <defaults>
</compile_context>

<pallas_src>
import math
from functools import partial

import jax
import jax.numpy as jnp
from jax import lax
from jax.experimental import pallas as pl
from jax.experimental.pallas import tpu as pltpu

_LN_EPS = 1e-5  # PyTorch nn.LayerNorm default


def _round_up(a, b):
    return (a + b - 1) // b * b


def _gelu_exact(x):
    # torch.nn.GELU() default (approximate='none'): 0.5*x*(1+erf(x/sqrt(2))).
    return 0.5 * x * (1.0 + lax.erf(x * (1.0 / math.sqrt(2.0))))


def _layernorm(x, gamma, beta, eps=_LN_EPS):
    mean = jnp.mean(x, axis=-1, keepdims=True)
    xc = x - mean
    var = jnp.mean(xc * xc, axis=-1, keepdims=True)
    return xc * lax.rsqrt(var + eps) * gamma + beta


def make_dft_matrix(dim, dtype=jnp.bfloat16):
    """Fused DFT matrix M = [cos | -sin], shape (dim, 2*dim), such that for real v:
       fft(v) = (v @ M)[:, :dim] + i * (v @ M)[:, dim:].
    One full-width matmul fills the 256-wide v6e/v7x MXU and shares the LHS push.
    bf16 is ample at dim<=256; pass jnp.float32 for dim >= 512 if needed."""
    n = jnp.arange(dim, dtype=jnp.int32)
    nk = (n[:, None] * n[None, :]) % dim                   # exact angle mod 2*pi
    ang = (2.0 * math.pi / dim) * nk.astype(jnp.float32)
    return jnp.concatenate([jnp.cos(ang), -jnp.sin(ang)], axis=1).astype(dtype)


# --------------------------------------------------------------------------- #
# Kernel: one (row-tile, layer) grid step of the fully fused FNet forward.
# --------------------------------------------------------------------------- #
def fnet_fused_kernel(x_ref,
                      ln1_g_ref, ln1_b_ref,
                      dft_cs_ref,
                      ln2_g_ref, ln2_b_ref,
                      w1_ref, b1_ref, w2_ref, b2_ref,
                      out_re_ref, out_im_ref):
    """Grid = (row_tiles, depth), depth innermost ("arbitrary").

    The two output refs double as the complex carry: their block index is
    constant across the depth axis, so they stay resident in VMEM for every
    layer of a row tile and are written back to HBM only once per tile."""
    layer = pl.program_id(1)
    dim = x_ref.shape[-1]

    # Layer 0: seed the carry with the real input; imaginary part starts at 0
    # (created directly in VMEM -- no zero plane is ever read from HBM).
    @pl.when(layer == 0)
    def _():
        out_re_ref[...] = x_ref[...]
        out_im_ref[...] = jnp.zeros_like(out_im_ref)

    xr = out_re_ref[...]                      # (tm, dim) f32  Re(x)
    xi = out_im_ref[...]                      # (tm, dim) f32  Im(x)

    # PreNorm1 -> FNetBlock1: feature-dim FFT == one fused DFT matmul against
    # [cos | -sin]  (bf16 MXU inputs, f32 accumulation).
    n1 = _layernorm(xr, ln1_g_ref[0], ln1_b_ref[0])
    fft = jnp.dot(n1.astype(dft_cs_ref.dtype), dft_cs_ref[...],
                  preferred_element_type=jnp.float32)       # (tm, 2*dim)
    yr = fft[:, :dim] + xr                    # complex residual
    yi = fft[:, dim:] + xi

    # PreNorm2 -> FeedForward: Linear -> GELU -> Dropout(0) -> Linear -> Dropout(0).
    n2 = _layernorm(yr, ln2_g_ref[0], ln2_b_ref[0])
    h = jnp.dot(n2.astype(w1_ref.dtype), w1_ref[0],
                preferred_element_type=jnp.float32) + b1_ref[0]
    h = _gelu_exact(h)                        # f32 elementwise (erf-exact)
    ff = jnp.dot(h.astype(w2_ref.dtype), w2_ref[0],
                 preferred_element_type=jnp.float32) + b2_ref[0]

    out_re_ref[...] = (ff + yr).astype(out_re_ref.dtype)    # FFN adds to Re only
    out_im_ref[...] = yi.astype(out_im_ref.dtype)


# --------------------------------------------------------------------------- #
# Host-side sizing helpers (generation-aware).
# --------------------------------------------------------------------------- #
def _vmem_capacity_bytes():
    cap = 0
    try:
        cap = int(getattr(pltpu.get_tpu_info(), "vmem_capacity_bytes", 0) or 0)
    except Exception:
        cap = 0
    if cap < (16 << 20) or cap > (256 << 20):
        cap = 64 << 20            # conservative fallback == v7x per-core VMEM
    return cap


def _choose_tiling(m, dim, hidden, dft_itemsize=2, w_itemsize=2):
    """Pick (tm, mpad, vmem_limit)."""
    cap = _vmem_capacity_bytes()
    vmem_limit = max(cap - (8 << 20), 24 << 20)     # ~8 MiB compiler headroom

    # VMEM that does not scale with tm: double-buffered per-layer weights,
    # resident DFT matrix, LN params / biases, plus slack for compiler scratch.
    fixed = (2 * dim * (2 * dim) * dft_itemsize
             + 2 * 2 * dim * hidden * w_itemsize
             + 4 * (6 * dim + hidden) * 4
             + (2 << 20))
    per_row = 4 * (16 * dim + 2 * hidden)           # row tiles + f32 intermediates
    tm_vmem = max(8, (vmem_limit - fixed) // per_row // 8 * 8)
    gen_cap = 1024 if cap >= (96 << 20) else 512    # v5e/v6e vs v7x

    m = max(int(m), 1)
    m8 = _round_up(m, 8)
    split_cap = max(8, (m8 // 4) // 8 * 8) if m8 >= 32 else m8   # >=2 tiles per TC
    cap_tm = max(8, min(tm_vmem, gen_cap, split_cap))

    if m % 8 == 0:                                  # prefer a tm that divides m
        floor_t = max(8, (cap_tm // 2) // 8 * 8)
        t = (min(cap_tm, m) // 8) * 8
        while t >= floor_t:
            if m % t == 0:
                return t, m, vmem_limit
            t -= 8
    tm = cap_tm
    return tm, _round_up(m, tm), vmem_limit


# --------------------------------------------------------------------------- #
# pallas_call wrapper.
# --------------------------------------------------------------------------- #
def _fnet_fused_call(x2d, p, dft_cs, *, tm, vmem_limit):
    mpad, dim = x2d.shape
    depth, _, hidden = p["w1"].shape
    n_tiles = mpad // tm

    row_spec = pl.BlockSpec((tm, dim), lambda i, l: (i, 0))
    dft_spec = pl.BlockSpec((dim, 2 * dim), lambda i, l: (0, 0))   # resident

    def per_layer_spec(arr):
        nz = arr.ndim - 1
        return pl.BlockSpec((1,) + tuple(arr.shape[1:]),
                            lambda i, l, _nz=nz: (l,) + (0,) * _nz)

    per_layer_w_bytes = (2 * dim * hidden * p["w1"].dtype.itemsize
                         + (6 * dim + hidden) * 4)
    cost = pl.CostEstimate(
        flops=int(4 * depth * mpad * dim * (dim + hidden)),
        transcendentals=int(depth * mpad * (hidden + 2)),
        bytes_accessed=int(3 * mpad * dim * 4
                           + 2 * dim * dim * dft_cs.dtype.itemsize
                           + n_tiles * depth * per_layer_w_bytes))

    out_re, out_im = pl.pallas_call(
        fnet_fused_kernel,
        out_shape=(jax.ShapeDtypeStruct((mpad, dim), jnp.float32),
                   jax.ShapeDtypeStruct((mpad, dim), jnp.float32)),
        grid_spec=pltpu.PrefetchScalarGridSpec(
            num_scalar_prefetch=0,
            grid=(n_tiles, depth),                 # depth innermost (carry axis)
            in_specs=[
                row_spec,                          # x row tile (read at layer 0)
                per_layer_spec(p["ln1_g"]), per_layer_spec(p["ln1_b"]),
                dft_spec,
                per_layer_spec(p["ln2_g"]), per_layer_spec(p["ln2_b"]),
                per_layer_spec(p["w1"]), per_layer_spec(p["b1"]),
                per_layer_spec(p["w2"]), per_layer_spec(p["b2"]),
            ],
            out_specs=(row_spec, row_spec),
        ),
        compiler_params=pltpu.CompilerParams(
            dimension_semantics=("parallel", "arbitrary"),
            vmem_limit_bytes=int(vmem_limit)),
        cost_estimate=cost,
    )(x2d,
      p["ln1_g"], p["ln1_b"],
      dft_cs,
      p["ln2_g"], p["ln2_b"],
      p["w1"], p["b1"], p["w2"], p["b2"])
    return out_re, out_im


@partial(jax.jit, static_argnames=("tm", "mpad", "vmem_limit"))
def _fnet_forward_jit(x, params, dft_cs, *, tm, mpad, vmem_limit):
    batch, seq, dim = x.shape
    m = batch * seq
    xr = x.reshape(m, dim).astype(jnp.float32)
    if mpad != m:                                  # ragged fallback only
        xr = jnp.pad(xr, ((0, mpad - m), (0, 0)))
    out_re, out_im = _fnet_fused_call(xr, params, dft_cs, tm=tm,
                                      vmem_limit=vmem_limit)
    if mpad != m:
        out_re, out_im = out_re[:m], out_im[:m]
    return lax.complex(out_re.reshape(batch, seq, dim),
                       out_im.reshape(batch, seq, dim))


def fnet_forward(x, params, dft_cs):
    """x: (batch, seq, dim) float -> complex64 (batch, seq, dim), like FNet1."""
    batch, seq, dim = x.shape
    hidden = params["w1"].shape[-1]
    tm, mpad, vmem_limit = _choose_tiling(
        batch * seq, dim, hidden,
        dft_itemsize=dft_cs.dtype.itemsize,
        w_itemsize=params["w1"].dtype.itemsize)
    return _fnet_forward_jit(x, params, dft_cs, tm=tm, mpad=mpad,
                             vmem_limit=vmem_limit)


# --------------------------------------------------------------------------- #
# Parameters (stacked on a leading depth axis) and pure-JAX references.
# --------------------------------------------------------------------------- #
def init_params(key, dim, hidden_dim, depth):
    """Stacked per-layer params. Linear weights are (in, out) = transpose of
    torch nn.Linear.weight, pre-cast to bf16 for the MXU; biases/LN stay f32."""
    keys = jax.random.split(key, 8)
    bnd1 = 1.0 / math.sqrt(dim)
    bnd2 = 1.0 / math.sqrt(hidden_dim)
    return dict(
        ln1_g=1.0 + 0.1 * jax.random.normal(keys[0], (depth, 1, dim), jnp.float32),
        ln1_b=0.1 * jax.random.normal(keys[1], (depth, 1, dim), jnp.float32),
        ln2_g=1.0 + 0.1 * jax.random.normal(keys[2], (depth, 1, dim), jnp.float32),
        ln2_b=0.1 * jax.random.normal(keys[3], (depth, 1, dim), jnp.float32),
        w1=jax.random.uniform(keys[4], (depth, dim, hidden_dim), jnp.float32,
                              -bnd1, bnd1).astype(jnp.bfloat16),
        b1=jax.random.uniform(keys[5], (depth, 1, hidden_dim), jnp.float32,
                              -bnd1, bnd1),
        w2=jax.random.uniform(keys[6], (depth, hidden_dim, dim), jnp.float32,
                              -bnd2, bnd2).astype(jnp.bfloat16),
        b2=jax.random.uniform(keys[7], (depth, 1, dim), jnp.float32, -bnd2, bnd2),
    )


def fnet_reference_matched(x, p, dft_cs):
    """Pure-JAX reference with the *same* bf16 matmul casts as the kernel."""
    batch, seq, dim = x.shape
    depth = p["w1"].shape[0]
    xr = x.reshape(-1, dim).astype(jnp.float32)
    xi = jnp.zeros_like(xr)
    for l in range(depth):
        n1 = _layernorm(xr, p["ln1_g"][l], p["ln1_b"][l]).astype(dft_cs.dtype)
        fft = jnp.dot(n1, dft_cs, preferred_element_type=jnp.float32)
        yr, yi = fft[:, :dim] + xr, fft[:, dim:] + xi
        n2 = _layernorm(yr, p["ln2_g"][l], p["ln2_b"][l])
        h = _gelu_exact(jnp.dot(n2.astype(p["w1"].dtype), p["w1"][l],
                                preferred_element_type=jnp.float32) + p["b1"][l])
        ff = jnp.dot(h.astype(p["w2"].dtype), p["w2"][l],
                     preferred_element_type=jnp.float32) + p["b2"][l]
        xr, xi = ff + yr, yi
    return lax.complex(xr.reshape(batch, seq, dim), xi.reshape(batch, seq, dim))


def fnet_reference_exact(x, p):
    """f32 / true-FFT reference following the PyTorch module literally."""
    depth = p["w1"].shape[0]
    xr = x.astype(jnp.float32)
    xi = jnp.zeros_like(xr)
    for l in range(depth):
        n1 = _layernorm(xr, p["ln1_g"][l], p["ln1_b"][l])
        f = jnp.fft.fft(n1, axis=-1)
        yr, yi = jnp.real(f) + xr, jnp.imag(f) + xi
        n2 = _layernorm(yr, p["ln2_g"][l], p["ln2_b"][l])
        h = _gelu_exact(n2 @ p["w1"][l].astype(jnp.float32) + p["b1"][l])
        ff = h @ p["w2"][l].astype(jnp.float32) + p["b2"][l]
        xr, xi = ff + yr, yi
    return lax.complex(xr, xi)


if __name__ == "__main__":
    # Small but lane-dense demo (dim multiple of 128 -> dense vst stores).
    batch, seq, dim, mlp_dim, depth = 2, 8, 128, 256, 2

    key = jax.random.PRNGKey(0)
    kx, kp = jax.random.split(key)
    x = jax.random.normal(kx, (batch, seq, dim), jnp.float32)
    params = init_params(kp, dim, mlp_dim, depth)
    dft_cs = make_dft_matrix(dim)

    out = jax.block_until_ready(fnet_forward(x, params, dft_cs))
    assert out.shape == (batch, seq, dim) and out.dtype == jnp.complex64

    # (1) Tight check vs a pure-JAX reference with identical bf16 matmul casts.
    ref = fnet_reference_matched(x, params, dft_cs)
    assert jnp.allclose(out.real, ref.real, atol=3e-2, rtol=3e-2), "real mismatch"
    assert jnp.allclose(out.imag, ref.imag, atol=3e-2, rtol=3e-2), "imag mismatch"

    # (2) Loose semantic check vs an exact f32 / true-FFT reference.
    ref_exact = fnet_reference_exact(x, params)
    assert jnp.allclose(out.real, ref_exact.real, atol=0.5, rtol=0.05), "real fft mismatch"
    assert jnp.allclose(out.imag, ref_exact.imag, atol=0.5, rtol=0.05), "imag fft mismatch"

    # (3) Exercise the ragged/padded row path (m not a multiple of 8 -> pad).
    x2 = jax.random.normal(jax.random.PRNGKey(1), (3, 5, dim), jnp.float32)
    out2 = jax.block_until_ready(fnet_forward(x2, params, dft_cs))
    ref2 = fnet_reference_matched(x2, params, dft_cs)
    assert jnp.allclose(out2.real, ref2.real, atol=3e-2, rtol=3e-2), "padded real mismatch"
    assert jnp.allclose(out2.imag, ref2.imag, atol=3e-2, rtol=3e-2), "padded imag mismatch"

    print("KERNEL_OK")
</pallas_src>

<mosaic_0001>
module attributes {stable_mosaic.version = 11 : i64} {
  func.func @fnet_fused_kernel(%arg0: i32, %arg1: i32, %arg2: memref<16x128xf32, #tpu.memory_space<vmem>>, %arg3: memref<1x1x128xf32, #tpu.memory_space<vmem>>, %arg4: memref<1x1x128xf32, #tpu.memory_space<vmem>>, %arg5: memref<128x256xbf16, #tpu.memory_space<vmem>>, %arg6: memref<1x1x128xf32, #tpu.memory_space<vmem>>, %arg7: memref<1x1x128xf32, #tpu.memory_space<vmem>>, %arg8: memref<1x128x256xbf16, #tpu.memory_space<vmem>>, %arg9: memref<1x1x256xf32, #tpu.memory_space<vmem>>, %arg10: memref<1x256x128xbf16, #tpu.memory_space<vmem>>, %arg11: memref<1x1x128xf32, #tpu.memory_space<vmem>>, %arg12: memref<16x128xf32, #tpu.memory_space<vmem>>, %arg13: memref<16x128xf32, #tpu.memory_space<vmem>>) attributes {dimension_semantics = [#tpu.dimension_semantics<parallel>, #tpu.dimension_semantics<arbitrary>], iteration_bounds = array<i64: 1, 2>, scalar_prefetch = 0 : i64, scratch_operands = 0 : i64, tpu.core_type = #tpu.core_type<tc>, window_params = [{transform_indices = @transform_0, window_bounds = array<i64: 16, 128>}, {transform_indices = @transform_1, window_bounds = array<i64: 1, 1, 128>}, {transform_indices = @transform_2, window_bounds = array<i64: 1, 1, 128>}, {pipeline_mode = #tpu.pipeline_mode<synchronous>, transform_indices = @transform_3, window_bounds = array<i64: 128, 256>}, {transform_indices = @transform_4, window_bounds = array<i64: 1, 1, 128>}, {transform_indices = @transform_5, window_bounds = array<i64: 1, 1, 128>}, {transform_indices = @transform_6, window_bounds = array<i64: 1, 128, 256>}, {transform_indices = @transform_7, window_bounds = array<i64: 1, 1, 256>}, {transform_indices = @transform_8, window_bounds = array<i64: 1, 256, 128>}, {transform_indices = @transform_9, window_bounds = array<i64: 1, 1, 128>}, {transform_indices = @transform_10, window_bounds = array<i64: 16, 128>}, {transform_indices = @transform_11, window_bounds = array<i64: 16, 128>}]} {
    %c0_i32 = arith.constant 0 : i32
    %0 = arith.cmpi eq, %arg1, %c0_i32 : i32
    %1 = arith.extui %0 : i1 to i32
    %c0_i32_0 = arith.constant 0 : i32
    %2 = arith.cmpi ne, %1, %c0_i32_0 : i32
    scf.if %2 {
      %c0_49 = arith.constant 0 : index
      %c0_50 = arith.constant 0 : index
      %87 = vector.load %arg2[%c0_49, %c0_50] : memref<16x128xf32, #tpu.memory_space<vmem>>, vector<16x128xf32>
      %c0_51 = arith.constant 0 : index
      %c0_52 = arith.constant 0 : index
      %88 = vector.load %arg12[%c0_51, %c0_52] : memref<16x128xf32, #tpu.memory_space<vmem>>, vector<16x128xf32>
      tpu.vector_store %arg12[%c0_51, %c0_52], %87 {strides = array<i32>} : memref<16x128xf32, #tpu.memory_space<vmem>>, vector<16x128xf32>,
      %cst_53 = arith.constant 0.000000e+00 : f32
      %89 = vector.broadcast %cst_53 : f32 to vector<16x128xf32>
      %c0_54 = arith.constant 0 : index
      %c0_55 = arith.constant 0 : index
      %90 = vector.load %arg13[%c0_54, %c0_55] : memref<16x128xf32, #tpu.memory_space<vmem>>, vector<16x128xf32>
      tpu.vector_store %arg13[%c0_54, %c0_55], %89 {strides = array<i32>} : memref<16x128xf32, #tpu.memory_space<vmem>>, vector<16x128xf32>,
    } else {
    }
    %c0 = arith.constant 0 : index
    %c0_1 = arith.constant 0 : index
    %3 = vector.load %arg12[%c0, %c0_1] : memref<16x128xf32, #tpu.memory_space<vmem>>, vector<16x128xf32>
    %c0_2 = arith.constant 0 : index
    %c0_3 = arith.constant 0 : index
    %4 = vector.load %arg13[%c0_2, %c0_3] : memref<16x128xf32, #tpu.memory_space<vmem>>, vector<16x128xf32>
    %c0_4 = arith.constant 0 : index
    %c0_5 = arith.constant 0 : index
    %c0_6 = arith.constant 0 : index
    %5 = vector.load %arg3[%c0_4, %c0_5, %c0_6] : memref<1x1x128xf32, #tpu.memory_space<vmem>>, vector<1x1x128xf32>
    %6 = vector.shape_cast %5 : vector<1x1x128xf32> to vector<1x128xf32>
    %c0_7 = arith.constant 0 : index
    %c0_8 = arith.constant 0 : index
    %c0_9 = arith.constant 0 : index
    %7 = vector.load %arg4[%c0_7, %c0_8, %c0_9] : memref<1x1x128xf32, #tpu.memory_space<vmem>>, vector<1x1x128xf32>
    %8 = vector.shape_cast %7 : vector<1x1x128xf32> to vector<1x128xf32>
    %cst = arith.constant dense<0.000000e+00> : vector<16xf32>
    %9 = vector.multi_reduction <add>, %3, %cst [1] : vector<16x128xf32> to vector<16xf32>
    %10 = vector.shape_cast %9 : vector<16xf32> to vector<16x1xf32>
    %cst_10 = arith.constant 1.280000e+02 : f32
    %11 = vector.broadcast %cst_10 : f32 to vector<16x1xf32>
    %12 = arith.divf %10, %11 : vector<16x1xf32>
    %13 = vector.broadcast %12 : vector<16x1xf32> to vector<16x128xf32>
    %14 = arith.subf %3, %13 : vector<16x128xf32>
    %15 = arith.mulf %14, %14 : vector<16x128xf32>
    %cst_11 = arith.constant dense<0.000000e+00> : vector<16xf32>
    %16 = vector.multi_reduction <add>, %15, %cst_11 [1] : vector<16x128xf32> to vector<16xf32>
    %17 = vector.shape_cast %16 : vector<16xf32> to vector<16x1xf32>
    %cst_12 = arith.constant 1.280000e+02 : f32
    %18 = vector.broadcast %cst_12 : f32 to vector<16x1xf32>
    %19 = arith.divf %17, %18 : vector<16x1xf32>
    %cst_13 = arith.constant 9.99999974E-6 : f32
    %20 = vector.broadcast %cst_13 : f32 to vector<16x1xf32>
    %21 = arith.addf %19, %20 : vector<16x1xf32>
    %22 = math.rsqrt %21 : vector<16x1xf32>
    %23 = vector.broadcast %22 : vector<16x1xf32> to vector<16x128xf32>
    %24 = arith.mulf %14, %23 : vector<16x128xf32>
    %25 = vector.broadcast %6 : vector<1x128xf32> to vector<16x128xf32>
    %26 = arith.mulf %24, %25 : vector<16x128xf32>
    %27 = vector.broadcast %8 : vector<1x128xf32> to vector<16x128xf32>
    %28 = arith.addf %26, %27 : vector<16x128xf32>
    %29 = arith.truncf %28 : vector<16x128xf32> to vector<16x128xbf16>
    %c0_14 = arith.constant 0 : index
    %c0_15 = arith.constant 0 : index
    %30 = vector.load %arg5[%c0_14, %c0_15] : memref<128x256xbf16, #tpu.memory_space<vmem>>, vector<128x256xbf16>
    %cst_16 = arith.constant dense<0.000000e+00> : vector<16x256xf32>
    %31 = tpu.matmul %29, %30, %cst_16 {dimension_numbers = #tpu.dot_dimension_numbers<[1], [0], [0], [1], [0, 0, 1, 1], [], []>} : vector<16x128xbf16>, vector<128x256xbf16>, vector<16x256xf32> -> vector<16x256xf32>
    %32 = vector.extract_strided_slice %31 {offsets = [0, 0], sizes = [16, 128], strides = [1, 1]} : vector<16x256xf32> to vector<16x128xf32>
    %33 = arith.addf %32, %3 : vector<16x128xf32>
    %34 = vector.extract_strided_slice %31 {offsets = [0, 128], sizes = [16, 128], strides = [1, 1]} : vector<16x256xf32> to vector<16x128xf32>
    %35 = arith.addf %34, %4 : vector<16x128xf32>
    %c0_17 = arith.constant 0 : index
    %c0_18 = arith.constant 0 : index
    %c0_19 = arith.constant 0 : index
    %36 = vector.load %arg6[%c0_17, %c0_18, %c0_19] : memref<1x1x128xf32, #tpu.memory_space<vmem>>, vector<1x1x128xf32>
    %37 = vector.shape_cast %36 : vector<1x1x128xf32> to vector<1x128xf32>
    %c0_20 = arith.constant 0 : index
    %c0_21 = arith.constant 0 : index
    %c0_22 = arith.constant 0 : index
    %38 = vector.load %arg7[%c0_20, %c0_21, %c0_22] : memref<1x1x128xf32, #tpu.memory_space<vmem>>, vector<1x1x128xf32>
    %39 = vector.shape_cast %38 : vector<1x1x128xf32> to vector<1x128xf32>
    %cst_23 = arith.constant dense<0.000000e+00> : vector<16xf32>
    %40 = vector.multi_reduction <add>, %33, %cst_23 [1] : vector<16x128xf32> to vector<16xf32>
    %41 = vector.shape_cast %40 : vector<16xf32> to vector<16x1xf32>
    %cst_24 = arith.constant 1.280000e+02 : f32
    %42 = vector.broadcast %cst_24 : f32 to vector<16x1xf32>
    %43 = arith.divf %41, %42 : vector<16x1xf32>
    %44 = vector.broadcast %43 : vector<16x1xf32> to vector<16x128xf32>
    %45 = arith.subf %33, %44 : vector<16x128xf32>
    %46 = arith.mulf %45, %45 : vector<16x128xf32>
    %cst_25 = arith.constant dense<0.000000e+00> : vector<16xf32>
    %47 = vector.multi_reduction <add>, %46, %cst_25 [1] : vector<16x128xf32> to vector<16xf32>
    %48 = vector.shape_cast %47 : vector<16xf32> to vector<16x1xf32>
    %cst_26 = arith.constant 1.280000e+02 : f32
    %49 = vector.broadcast %cst_26 : f32 to vector<16x1xf32>
    %50 = arith.divf %48, %49 : vector<16x1xf32>
    %cst_27 = arith.constant 9.99999974E-6 : f32
    %51 = vector.broadcast %cst_27 : f32 to vector<16x1xf32>
    %52 = arith.addf %50, %51 : vector<16x1xf32>
    %53 = math.rsqrt %52 : vector<16x1xf32>
    %54 = vector.broadcast %53 : vector<16x1xf32> to vector<16x128xf32>
    %55 = arith.mulf %45, %54 : vector<16x128xf32>
    %56 = vector.broadcast %37 : vector<1x128xf32> to vector<16x128xf32>
    %57 = arith.mulf %55, %56 : vector<16x128xf32>
    %58 = vector.broadcast %39 : vector<1x128xf32> to vector<16x128xf32>
    %59 = arith.addf %57, %58 : vector<16x128xf32>
    %60 = arith.truncf %59 : vector<16x128xf32> to vector<16x128xbf16>
    %c0_28 = arith.constant 0 : index
    %c0_29 = arith.constant 0 : index
    %c0_30 = arith.constant 0 : index
    %61 = vector.load %arg8[%c0_28, %c0_29, %c0_30] : memref<1x128x256xbf16, #tpu.memory_space<vmem>>, vector<1x128x256xbf16>
    %62 = vector.shape_cast %61 : vector<1x128x256xbf16> to vector<128x256xbf16>
    %cst_31 = arith.constant dense<0.000000e+00> : vector<16x256xf32>
    %63 = tpu.matmul %60, %62, %cst_31 {dimension_numbers = #tpu.dot_dimension_numbers<[1], [0], [0], [1], [0, 0, 1, 1], [], []>} : vector<16x128xbf16>, vector<128x256xbf16>, vector<16x256xf32> -> vector<16x256xf32>
    %c0_32 = arith.constant 0 : index
    %c0_33 = arith.constant 0 : index
    %c0_34 = arith.constant 0 : index
    %64 = vector.load %arg9[%c0_32, %c0_33, %c0_34] : memref<1x1x256xf32, #tpu.memory_space<vmem>>, vector<1x1x256xf32>
    %65 = vector.shape_cast %64 : vector<1x1x256xf32> to vector<1x256xf32>
    %66 = vector.broadcast %65 : vector<1x256xf32> to vector<16x256xf32>
    %67 = arith.addf %63, %66 : vector<16x256xf32>
    %cst_35 = arith.constant 5.000000e-01 : f32
    %68 = vector.broadcast %cst_35 : f32 to vector<16x256xf32>
    %69 = arith.mulf %68, %67 : vector<16x256xf32>
    %cst_36 = arith.constant 0.707106769 : f32
    %70 = vector.broadcast %cst_36 : f32 to vector<16x256xf32>
    %71 = arith.mulf %67, %70 : vector<16x256xf32>
    %72 = math.erf %71 : vector<16x256xf32>
    %cst_37 = arith.constant 1.000000e+00 : f32
    %73 = vector.broadcast %cst_37 : f32 to vector<16x256xf32>
    %74 = arith.addf %73, %72 : vector<16x256xf32>
    %75 = arith.mulf %69, %74 : vector<16x256xf32>
    %76 = arith.truncf %75 : vector<16x256xf32> to vector<16x256xbf16>
    %c0_38 = arith.constant 0 : index
    %c0_39 = arith.constant 0 : index
    %c0_40 = arith.constant 0 : index
    %77 = vector.load %arg10[%c0_38, %c0_39, %c0_40] : memref<1x256x128xbf16, #tpu.memory_space<vmem>>, vector<1x256x128xbf16>
    %78 = vector.shape_cast %77 : vector<1x256x128xbf16> to vector<256x128xbf16>
    %cst_41 = arith.constant dense<0.000000e+00> : vector<16x128xf32>
    %79 = tpu.matmul %76, %78, %cst_41 {dimension_numbers = #tpu.dot_dimension_numbers<[1], [0], [0], [1], [0, 0, 1, 1], [], []>} : vector<16x256xbf16>, vector<256x128xbf16>, vector<16x128xf32> -> vector<16x128xf32>
    %c0_42 = arith.constant 0 : index
    %c0_43 = arith.constant 0 : index
    %c0_44 = arith.constant 0 : index
    %80 = vector.load %arg11[%c0_42, %c0_43, %c0_44] : memref<1x1x128xf32, #tpu.memory_space<vmem>>, vector<1x1x128xf32>
    %81 = vector.shape_cast %80 : vector<1x1x128xf32> to vector<1x128xf32>
    %82 = vector.broadcast %81 : vector<1x128xf32> to vector<16x128xf32>
    %83 = arith.addf %79, %82 : vector<16x128xf32>
    %84 = arith.addf %83, %33 : vector<16x128xf32>
    %c0_45 = arith.constant 0 : index
    %c0_46 = arith.constant 0 : index
    %85 = vector.load %arg12[%c0_45, %c0_46] : memref<16x128xf32, #tpu.memory_space<vmem>>, vector<16x128xf32>
    tpu.vector_store %arg12[%c0_45, %c0_46], %84 {strides = array<i32>} : memref<16x128xf32, #tpu.memory_space<vmem>>, vector<16x128xf32>,
    %c0_47 = arith.constant 0 : index
    %c0_48 = arith.constant 0 : index
    %86 = vector.load %arg13[%c0_47, %c0_48] : memref<16x128xf32, #tpu.memory_space<vmem>>, vector<16x128xf32>
    tpu.vector_store %arg13[%c0_47, %c0_48], %35 {strides = array<i32>} : memref<16x128xf32, #tpu.memory_space<vmem>>, vector<16x128xf32>,
    return
  }
  func.func @transform_0(%arg0: i32, %arg1: i32) -> (i32, i32) {
    %c0_i32 = arith.constant 0 : i32
    %c0_i32_0 = arith.constant 0 : i32
    return %arg0, %c0_i32 : i32, i32
  }
  func.func @transform_1(%arg0: i32, %arg1: i32) -> (i32, i32, i32) {
    %c0_i32 = arith.constant 0 : i32
    %c0_i32_0 = arith.constant 0 : i32
    %c0_i32_1 = arith.constant 0 : i32
    return %arg1, %c0_i32, %c0_i32_0 : i32, i32, i32
  }
  func.func @transform_2(%arg0: i32, %arg1: i32) -> (i32, i32, i32) {
    %c0_i32 = arith.constant 0 : i32
    %c0_i32_0 = arith.constant 0 : i32
    %c0_i32_1 = arith.constant 0 : i32
    return %arg1, %c0_i32, %c0_i32_0 : i32, i32, i32
  }
  func.func @transform_3(%arg0: i32, %arg1: i32) -> (i32, i32) {
    %c0_i32 = arith.constant 0 : i32
    %c0_i32_0 = arith.constant 0 : i32
    %c0_i32_1 = arith.constant 0 : i32
    return %c0_i32, %c0_i32_0 : i32, i32
  }
  func.func @transform_4(%arg0: i32, %arg1: i32) -> (i32, i32, i32) {
    %c0_i32 = arith.constant 0 : i32
    %c0_i32_0 = arith.constant 0 : i32
    %c0_i32_1 = arith.constant 0 : i32
    return %arg1, %c0_i32, %c0_i32_0 : i32, i32, i32
  }
  func.func @transform_5(%arg0: i32, %arg1: i32) -> (i32, i32, i32) {
    %c0_i32 = arith.constant 0 : i32
    %c0_i32_0 = arith.constant 0 : i32
    %c0_i32_1 = arith.constant 0 : i32
    return %arg1, %c0_i32, %c0_i32_0 : i32, i32, i32
  }
  func.func @transform_6(%arg0: i32, %arg1: i32) -> (i32, i32, i32) {
    %c0_i32 = arith.constant 0 : i32
    %c0_i32_0 = arith.constant 0 : i32
    %c0_i32_1 = arith.constant 0 : i32
    return %arg1, %c0_i32, %c0_i32_0 : i32, i32, i32
  }
  func.func @transform_7(%arg0: i32, %arg1: i32) -> (i32, i32, i32) {
    %c0_i32 = arith.constant 0 : i32
    %c0_i32_0 = arith.constant 0 : i32
    %c0_i32_1 = arith.constant 0 : i32
    return %arg1, %c0_i32, %c0_i32_0 : i32, i32, i32
  }
  func.func @transform_8(%arg0: i32, %arg1: i32) -> (i32, i32, i32) {
    %c0_i32 = arith.constant 0 : i32
    %c0_i32_0 = arith.constant 0 : i32
    %c0_i32_1 = arith.constant 0 : i32
    return %arg1, %c0_i32, %c0_i32_0 : i32, i32, i32
  }
  func.func @transform_9(%arg0: i32, %arg1: i32) -> (i32, i32, i32) {
    %c0_i32 = arith.constant 0 : i32
    %c0_i32_0 = arith.constant 0 : i32
    %c0_i32_1 = arith.constant 0 : i32
    return %arg1, %c0_i32, %c0_i32_0 : i32, i32, i32
  }
  func.func @transform_10(%arg0: i32, %arg1: i32) -> (i32, i32) {
    %c0_i32 = arith.constant 0 : i32
    %c0_i32_0 = arith.constant 0 : i32
    return %arg0, %c0_i32 : i32, i32
  }
  func.func @transform_11(%arg0: i32, %arg1: i32) -> (i32, i32) {
    %c0_i32 = arith.constant 0 : i32
    %c0_i32_0 = arith.constant 0 : i32
    return %arg0, %c0_i32 : i32, i32
  }
}

</mosaic_0001>

<bundles_post_ra>
// kernel: custom-call
= control target key start
LH: loop header
LB: loop body
LE: loop exit
PB: predicated region body
PF: predicated region fallthrough
CT: control target
= control target key end

     0   :  { %s126_s0 = inlined_call_operand.vmem [shape: f32[2,8,128], index: 0, kind: input, shape index: {}]   ;;  %s127_s1 = inlined_call_operand.vmem [shape: f32[2,8,128], index: 1, kind: input, shape index: {}]   ;;  %s128_s2 = inlined_call_operand.hbm [shape: c64[2,8,128], index: 2, kind: output, shape index: {}]  }
   0x1   :  { %s87_s11 = scalar_lea.hbm %s128_s2, 256 }
   0x2   :  { %4 = vsyncpa [#allocation0], 0  ;;  %s5_s14 = sshll.u32 %s126_s0, 4  ;;  %s6_s14 = int_to_ptr.vmem [resolvable:$true] %s5_s14 }
   0x3   :  { %s18_s15 = scalar_lea.vmem %s6_s14, 256  ;;  %p23_p1 = scmp.lt.s32.totalorder %s6_s14, %s6_s14 }
   0x4   :  { %p19_p0 = scmp.ne.s32.totalorder %s6_s14, %s18_s15  ;;  %p24_p2 = scmp.lt.s32.totalorder %s18_s15, %s18_s15 }
   0x6   :  { %p25_p3 = por %p24_p2, %p23_p1 }
   0x8   :  { %p26_p4 = pnand %p25_p3, %p19_p0 }
   0xa   :  { %29 = shalt.err (!%p26_p4)  }
   0xb   :  { %p31_p5 = scmp.ne.s32.totalorder %s128_s2, %s87_s11  ;;  %s32_s0 = scalar_lea.hbm %s128_s2, 512 }
   0xc   :  { %p33_p6 = scmp.lt.u32.totalorder %s32_s0, %s87_s11  ;;  %p34_p7 = scmp.lt.u32.totalorder %s87_s11, %s128_s2 }
   0xe   :  { %p35_p8 = por %p34_p7, %p33_p6 }
  0x10   :  { %p36_p9 = pnand %p35_p8, %p31_p5 }
  0x12   :  { %39 = shalt.err (!%p36_p9)  }
  0x13   :  { %8 = dma.vmem_to_hbm [thread:$0]  %s6_s14, 256, %s128_s2, [#allocation0] }
  0x14   :  { %65 = dma.done.wait [#allocation0], 256  }
  0x15   :  { %66 = vsyncadd [#allocation0], 4294967040 }
  0x16   :  { %10 = vsyncpa [#allocation0], 1 }
  0x17   :  { %11 = vsyncpa [#allocation1], 0  ;;  %s12_s28 = sshll.u32 %s127_s1, 4  ;;  %s13_s28 = int_to_ptr.vmem [resolvable:$true] %s12_s28 }
  0x18   :  { %s40_s29 = scalar_lea.vmem %s13_s28, 256  ;;  %p45_p11 = scmp.lt.s32.totalorder %s13_s28, %s13_s28 }
  0x19   :  { %p41_p10 = scmp.ne.s32.totalorder %s13_s28, %s40_s29  ;;  %p46_p12 = scmp.lt.s32.totalorder %s40_s29, %s40_s29 }
  0x1b   :  { %p47_p13 = por %p46_p12, %p45_p11 }
  0x1d   :  { %p48_p0 = pnand %p47_p13, %p41_p10 }
  0x1f   :  { %51 = shalt.err (!%p48_p0)  }
  0x20   :  { %p53_p1 = scmp.ne.s32.totalorder %s87_s11, %s32_s0  ;;  %p56_p2 = scmp.lt.u32.totalorder %s32_s0, %s32_s0 }
  0x22   :  { %p57_p3 = por %p56_p2, %p34_p7 }
  0x24   :  { %p59_p4 = por %p57_p3, %p33_p6 }
  0x26   :  { %p60_p5 = pnand %p59_p4, %p53_p1 }
  0x28   :  { %63 = shalt.err (!%p60_p5)  }
  0x29   :  { %15 = dma.vmem_to_hbm [thread:$0]  %s13_s28, 256, %s87_s11, [#allocation1] }
  0x2a   :  { %67 = dma.done.wait [#allocation1], 256  }
  0x2b   :  { %68 = vsyncadd [#allocation1], 4294967040 }
  0x2c   :  { %17 = vsyncpa [#allocation1], 1 }

// kernel: _fnet_forward_jit.1
= control target key start
LH: loop header
LB: loop body
LE: loop exit
PB: predicated region body
PF: predicated region fallthrough
CT: control target
= control target key end

     0   :  { %s2293_s0 = inlined_call_operand.hbm [shape: f32[16,128], index: 0, kind: input, shape index: {}]   ;;  %s2294_s1 = inlined_call_operand.vmem [shape: f32[2,1,128], index: 1, kind: input, shape index: {}]   ;;  %s2295_s2 = inlined_call_operand.vmem [shape: f32[2,1,128], index: 2, kind: input, shape index: {}]   ;;  %s2296_s3 = inlined_call_operand.hbm [shape: bf16[128,256], index: 3, kind: input, shape index: {}]   ;;  %s2297_s4 = inlined_call_operand.vmem [shape: f32[2,1,128], index: 4, kind: input, shape index: {}]   ;;  %s2298_s5 = inlined_call_operand.vmem [shape: f32[2,1,128], index: 5, kind: input, shape index: {}]   ;;  %s2299_s6 = inlined_call_operand.hbm [shape: bf16[2,128,256], index: 6, kind: input, shape index: {}]   ;;  %s2300_s7 = inlined_call_operand.vmem [shape: f32[2,1,256], index: 7, kind: input, shape index: {}]   ;;  %s2301_s8 = inlined_call_operand.hbm [shape: bf16[2,256,128], index: 8, kind: input, shape index: {}]   ;;  %s2302_s9 = inlined_call_operand.vmem [shape: f32[2,1,128], index: 9, kind: input, shape index: {}]   ;;  %s2303_s10 = inlined_call_operand.vmem [shape: f32[16,128], index: 10, kind: output, shape index: {0}]   ;;  %s2304_s11 = inlined_call_operand.vmem [shape: f32[16,128], index: 11, kind: output, shape index: {1}]  }
   0x1   :  { %2325 = sst [smem:[#allocation14_spill]] %s2293_s0 }
   0x2   :  { %2326 = sst [smem:[#allocation15_spill]] %s2298_s5 }
   0x3   :  { %2327 = sst [smem:[#allocation16_spill]] %s2299_s6 }
   0x4   :  { %2328 = sst [smem:[#allocation17_spill]] %s2300_s7 }
   0x5   :  { %2329 = sst [smem:[#allocation18_spill]] %s2302_s9 }
   0x6   :  { %2330 = sst [smem:[#allocation19_spill]] %s2303_s10 }
   0x7   :  { %2331 = sst [smem:[#allocation20_spill]] %s2304_s11 }
   0x8   :  { %17 = vsyncpa [#allocation3], 0 }
   0x9   :  { %18 = vsyncpa [#allocation5], 0  ;;  %s1906_s17 = smov 0   ;;  %s1908_s18 = smov 0  }
   0xa   :  { %s1910_s19 = smov 0   ;;  %s1912_s20 = smov 0  }
   0xb   :  { %s1914_s21 = smov 0   ;;  %s1916_s22 = smov 0  }
   0xc LB: > { %2332 = sst [smem:[#allocation11_spill]] %s1822_s19  ;;  %s2305_s23 = sadd.s32 4294967295, %s1834_s22   ;;  %s1834_s22 = sphi %s1916_s22, %s24_s22   ;;  %s1830_s21 = sphi %s1914_s21, %s2372_s21   ;;  %s1826_s20 = sphi %s1912_s20, %s2371_s20   ;;  %s1822_s19 = sphi %s1910_s19, %s2367_s19   ;;  %s1818_s18 = sphi %s1908_s18, %s2370_s18   ;;  %s1814_s17 = sphi %s1906_s17, %s2369_s17  }
   0xd   : > { %p201_p0 = scmp.ne.s32.totalorder %s1822_s19, %s1818_s18  ;;  %p202_p1 = scmp.eq.s32.totalorder %s1834_s22, 0 }
   0xe   : > { %p207_p2 = scmp.ne.s32.totalorder %s1818_s18, %s1814_s17  ;;  %p1942_p3 = scmp.eq.s32.totalorder %s2305_s23, 0 }
   0xf   : > { %p203_p4 = por %p202_p1, %p201_p0  ;;  %p1393_p5 = scmp.ge.s32.totalorder %s1834_s22, 1 }
  0x10   : > { %s2333_s25 = scalar_select %p1942_p3, 1, 0 }
  0x11   : > { %p1949_p6 = por %p1942_p3, %p207_p2  ;;  %p348_p7 = scmp.lt.s32.totalorder %s1834_s22, 3 }
  0x12   : > { %s1836_s28 = smov [#allocation2]   ;;  %p1521_p10 = scmp.lt.s32.totalorder %s1834_s22, 2 }
  0x13   : > { %s2334_s26 = scalar_select %p1949_p6, 1, 0 }
  0x14   : > { %p1954_p8 = pnand %p1393_p5, %p348_p7  ;;  %s363_s29 = sshll.u32 %s1836_s28, 4  ;;  %s364_s29 = int_to_ptr.vmem [resolvable:$true] %s363_s29 }
  0x15   : > { %p1967_p12 = pnand %p1521_p10, %p203_p4  ;;  %s33_s13 = sadd.s32 1, %s1830_s21 }
  0x16   : > { %s2335_s27 = scalar_select %p1954_p8, 1, 0 }
  0x17   : > { %p1505_p9 = pneg %p1954_p8  ;;  %s2338_s0 = sld [smem:[#allocation14_spill]] }
  0x18   : > { %s2337_s12 = scalar_select %p1967_p12, 1, 0 }
  0x19   : > { %p1963_p11 = pnand %p1505_p9, %p1942_p3 }
  0x1b   : > { %p2320_p0 = pneg %p1963_p11 }
  0x1d   : > { %s1660_s16 = scalar_lea.hbm %s2338_s0, 256 }
  0x1e   : > { %p1661_p13 = scmp.ne.s32.totalorder %s2338_s0, %s1660_s16  ;;  %p1667_p4 = scmp.lt.u32.totalorder %s1660_s16, %s2338_s0 }
  0x20   : > { %p1663_p1 = pnand %p2320_p0, %p1661_p13 }
  0x22   : > { %p1664_p2 = pneg %p1663_p1 }
  0x24   : > { %p1669_p5 = pnand %p1667_p4, %p1664_p2 }
  0x26   : > { %1672 = shalt.err (!%p1669_p5)
}
  0x27   : > { %s1673_s11 = scalar_lea.vmem %s364_s29, 256  ;;  %p1681_p6 = scmp.lt.s32.totalorder %s364_s29, %s364_s29 }
  0x28   : > { %p1674_p7 = scmp.ne.s32.totalorder %s364_s29, %s1673_s11  ;;  %p1682_p3 = scmp.lt.s32.totalorder %s1673_s11, %s1673_s11 }
  0x2a   : > { %p1676_p9 = pnand %p1674_p7, %p2320_p0  ;;  %p1683_p8 = por %p1682_p3, %p1681_p6 }
  0x2c   : > { %p1677_p10 = pneg %p1676_p9 }
  0x2e   : > { %p1684_p12 = pnand %p1683_p8, %p1677_p10 }
  0x30   : > { %1687 = shalt.err (!%p1684_p12)
}
  0x31   : > { %s2315_s14 = smov 128   ;;  %s2317_s23 = smov 8  }
  0x32   : > { %1508 = dma.hbm_to_vmem [thread:$0]  (!%p1963_p11), %s2338_s0, 256, %s364_s29, [#allocation3], %s2315_s14, %s2315_s14, %s2317_s23  }
  0x33   : > { %p34_p3 = scmp.ge.s32.totalorder %s33_s13, 2  ;;  %s414_s11 = sand.u32 1, %s1834_s22  }
  0x34   : > { %s416_s16 = sand.u32 1, %s1822_s19   ;;  %s2319_s10 = sshll.u32 %s1830_s21, 11 }
  0x35   : > { %s2374_s13 = smov (%p34_p3, %s33_s13), 0  ;;  %s2001_s17 = sshll.u32 %s416_s16, 7 }
  0x36   : > { %2339 = sst [smem:[#allocation12_spill]] %s2374_s13  ;;  %s191_s28 = ssub.s32 %s1830_s21, %s2374_s13 }
  0x37   : > { %p192_p6 = scmp.eq.s32.totalorder %s191_s28, 0  ;;  %s2340_s6 = sld [smem:[#allocation16_spill]] }
  0x38   : > { %s418_s29 = scalar_lea.vmem [#allocation6], %s2001_s17  ;;  %s2341_s14 = sadd.s32 1, %s1822_s19 }
  0x39   : > { %s425_s15 = sshll.u32 %s418_s29, 4  ;;  %s2021_s16 = scalar_lea.sflag [#allocation3], %s414_s11  ;;  %s2019_s15 = int_to_ptr.vmem [resolvable:$true] %s425_s15 }
  0x3a   : > { %s2017_s23 = scalar_select %p192_p6, %s1822_s19, %s2341_s14  }
  0x3b   : > { %p2343_p12 = scmp.ne.s32.totalorder %s2337_s12, 0 }
  0x3c   : > { %2342 = sst [smem:[#allocation13_spill]] %s2017_s23 }
  0x3d   : > { %s2011_s24 = scalar_lea.hbm %s2340_s6, %s2319_s10  ;;  %p2323_p13 = pneg %p2343_p12 }
  0x3e   : > { %s1688_s28 = scalar_lea.hbm %s2011_s24, 2048  ;;  %s1693_s10 = scalar_lea.hbm %s2340_s6, 4096 }
  0x3f   : > { %p1689_p8 = scmp.ne.s32.totalorder %s2011_s24, %s1688_s28  ;;  %p1694_p4 = scmp.lt.u32.totalorder %s2011_s24, %s2340_s6 }
  0x40   : > { %p1695_p5 = scmp.lt.u32.totalorder %s1693_s10, %s1688_s28  ;;  %p1697_p9 = scmp.lt.u32.totalorder %s1688_s28, %s2011_s24 }
  0x41   : > { %p1691_p1 = pnand %p2323_p13, %p1689_p8 }
  0x42   : > { %p1696_p7 = por %p1695_p5, %p1694_p4 }
  0x43   : > { %p1692_p2 = pneg %p1691_p1 }
  0x44   : > { %p1698_p10 = por %p1697_p9, %p1696_p7 }
  0x46   : > { %p1699_p3 = pnand %p1698_p10, %p1692_p2 }
  0x48   : > { %1702 = shalt.err (!%p1699_p3)
}
  0x49   : > { %s1703_s14 = scalar_lea.vmem %s2019_s15, 2048  ;;  %s1839_s11 = smov [#allocation6]  }
  0x4a   : > { %p1704_p6 = scmp.ne.s32.totalorder %s2019_s15, %s1703_s14  ;;  %s1708_s7 = sshll.u32 %s1839_s11, 4  ;;  %s1709_s7 = int_to_ptr.vmem [resolvable:$false] %s1708_s7 }
  0x4b   : > { %s1710_s0 = scalar_lea.vmem %s1709_s7, 4096  ;;  %p1711_p0 = scmp.lt.s32.totalorder %s2019_s15, %s1709_s7 }
  0x4c   : > { %p1706_p8 = pnand %p1704_p6, %p2323_p13  ;;  %p1712_p4 = scmp.lt.s32.totalorder %s1710_s0, %s1703_s14 }
  0x4e   : > { %p1707_p1 = pneg %p1706_p8  ;;  %p1713_p5 = por %p1712_p4, %p1711_p0 }
  0x50   : > { %p1714_p7 = pnand %p1713_p5, %p1707_p1 }
  0x52   : > { %1717 = shalt.err (!%p1714_p7)
}
  0x53   : > { %s2344_s10 = smov 8   ;;  %s2345_s28 = smov 128  }
  0x54   : > { %1515 = dma.hbm_to_vmem [thread:$0]  (!%p2343_p12), %s2011_s24, 2048, %s2019_s15, %s2021_s16, %s2345_s28, %s2345_s28, %s2344_s10  }
  0x55   : > { %s1840_s9 = smov [#allocation4]   ;;  %s2346_s11 = sshll.u32 %s1830_s21, 11 }
  0x56   : > { %s376_s29 = sshll.u32 %s1840_s9, 4  ;;  %s2057_s0 = scalar_lea.hbm %s2301_s8, %s2346_s11  ;;  %s377_s29 = int_to_ptr.vmem [resolvable:$true] %s376_s29 }
  0x57   : > { %s1718_s23 = scalar_lea.hbm %s2296_s3, 2048  ;;  %p2347_p2 = pneg %p1963_p11 }
  0x58   : > { %p1719_p0 = scmp.ne.s32.totalorder %s2296_s3, %s1718_s23  ;;  %p1725_p3 = scmp.lt.u32.totalorder %s1718_s23, %s2296_s3 }
  0x5a   : > { %p1721_p9 = pnand %p1719_p0, %p2347_p2 }
  0x5c   : > { %p1722_p10 = pneg %p1721_p9 }
  0x5e   : > { %p1727_p6 = pnand %p1725_p3, %p1722_p10 }
  0x60   : > { %1730 = shalt.err (!%p1727_p6)
}
  0x61   : > { %s1731_s9 = scalar_lea.vmem %s377_s29, 2048  ;;  %p2348_p1 = pmov %p2347_p2 }
  0x62   : > { %p1732_p8 = scmp.ne.s32.totalorder %s377_s29, %s1731_s9  ;;  %p1739_p7 = scmp.lt.s32.totalorder %s377_s29, %s377_s29 }
  0x63   : > { %p1740_p13 = scmp.lt.s32.totalorder %s1731_s9, %s1731_s9 }
  0x64   : > { %p1734_p4 = pnand %p1732_p8, %p2348_p1 }
  0x65   : > { %p1741_p12 = por %p1740_p13, %p1739_p7 }
  0x66   : > { %p1735_p5 = pneg %p1734_p4 }
  0x68   : > { %p1742_p0 = pnand %p1741_p12, %p1735_p5 }
  0x6a   : > { %1745 = shalt.err (!%p1742_p0)
}
  0x6b   : > { %1511 = dma.hbm_to_vmem [thread:$0]  (!%p1963_p11), %s2296_s3, 2048, %s377_s29, [#allocation5], %s2345_s28, %s2345_s28, %s2344_s10  }
  0x6c   : > { %s446_s19 = scalar_lea.vmem [#allocation7], %s2001_s17  ;;  %s1746_s23 = scalar_lea.hbm %s2057_s0, 2048 }
  0x6d   : > { %s453_s13 = sshll.u32 %s446_s19, 4  ;;  %p1747_p12 = scmp.ne.s32.totalorder %s2057_s0, %s1746_s23  ;;  %s2083_s13 = int_to_ptr.vmem [resolvable:$true] %s453_s13 }
  0x6e   : > { %p2349_p13 = scmp.ne.s32.totalorder %s2337_s12, 0  ;;  %s1751_s7 = scalar_lea.hbm %s2301_s8, 4096 }
  0x6f   : > { %p1752_p3 = scmp.lt.u32.totalorder %s2057_s0, %s2301_s8  ;;  %p1753_p6 = scmp.lt.u32.totalorder %s1751_s7, %s1746_s23 }
  0x70   : > { %p2350_p2 = pneg %p2349_p13  ;;  %p1755_p8 = scmp.lt.u32.totalorder %s1746_s23, %s2057_s0 }
  0x71   : > { %p1754_p11 = por %p1753_p6, %p1752_p3 }
  0x72   : > { %p1749_p9 = pnand %p1747_p12, %p2350_p2 }
  0x73   : > { %p1756_p1 = por %p1755_p8, %p1754_p11 }
  0x74   : > { %p1750_p10 = pneg %p1749_p9 }
  0x76   : > { %p1757_p4 = pnand %p1756_p1, %p1750_p10 }
  0x78   : > { %1760 = shalt.err (!%p1757_p4)
}
  0x79   : > { %s1761_s17 = scalar_lea.vmem %s2083_s13, 2048  ;;  %p2351_p7 = pmov %p2350_p2 }
  0x7a   : > { %p1762_p5 = scmp.ne.s32.totalorder %s2083_s13, %s1761_s17  ;;  %s1841_s10 = smov [#allocation7]  }
  0x7b   : > { %s1766_s28 = sshll.u32 %s1841_s10, 4  ;;  %s1767_s28 = int_to_ptr.vmem [resolvable:$false] %s1766_s28 }
  0x7c   : > { %p1764_p0 = pnand %p1762_p5, %p2351_p7  ;;  %s1768_s29 = scalar_lea.vmem %s1767_s28, 4096 }
  0x7d   : > { %p1769_p2 = scmp.lt.s32.totalorder %s2083_s13, %s1767_s28  ;;  %p1770_p9 = scmp.lt.s32.totalorder %s1768_s29, %s1761_s17 }
  0x7e   : > { %p1765_p12 = pneg %p1764_p0 }
  0x7f   : > { %p1771_p3 = por %p1770_p9, %p1769_p2 }
  0x81   : > { %p1772_p6 = pnand %p1771_p3, %p1765_p12 }
  0x83   : > { %1775 = shalt.err (!%p1772_p6)
}
  0x84   : > { %s1842_s15 = smov 64   ;;  %s1843_s9 = smov 4  }
  0x85   : > { %1518 = dma.hbm_to_vmem [thread:$0]  (!%p2349_p13), %s2057_s0, 2048, %s2083_s13, %s2021_s16, %s1842_s15, %s1842_s15, %s1843_s9  }
  0x86   : > { %p2352_p10 = scmp.ne.s32.totalorder %s2335_s27, 0 }
  0x87   : > { %p2353_p11 = scmp.ne.s32.totalorder (!%p2352_p10), %s2333_s25, 0 }
  0x88   : > { %471 = sbr.rel (%p2352_p10) target bundleno = 1479 (0x5c7), region = 60 }
  0x8f   : > { %1801 = dma.done.wait (%p2353_p11), [#allocation3], 256  }
  0x90   : > { %1803 = vsyncadd (%p2353_p11), [#allocation3], 4294967040 }
  0x91   : > { %1805 = dma.done.wait (%p2353_p11), [#allocation5], 2048  }
  0x92   : > { %1807 = vsyncadd (%p2353_p11), [#allocation5], 4294965248  ;;  %s2354_s5 = sadd.s32 4294967295, %s1834_s22   ;;  %s483_s16 = sand.u32 1, %s1818_s18  }
  0x93   : > { %s481_s12 = sand.u32 1, %s2354_s5   ;;  %s1406_s27 = sshll.u32 %s483_s16, 7 }
  0x94   : > { %s482_s0 = scalar_lea.sflag [#allocation3], %s481_s12  ;;  %s2122_s6 = scalar_lea.vmem [#allocation6], %s1406_s27 }
  0x95   : > { %p2355_p13 = scmp.ne.s32.totalorder %s2334_s26, 0 }
  0x97   : > { %1809 = dma.done.wait (%p2355_p13), %s482_s0, 4096  }
  0x98   : > { %1811 = vsyncadd (%p2355_p13), %s482_s0, 4294963200  ;;  %p563_p8 = scmp.lt.s32.totalorder %s1826_s20, 1  ;;  %s2356_s28 = sld [smem:[#allocation15_spill]] }
  0x99   : > { %s2357_s12 = sld [smem:[#allocation18_spill]]  ;;  %s2358_s13 = sld [smem:[#allocation17_spill]] }
  0x9a   : > { %s2130_s25 = scalar_select %p563_p8, %s1826_s20, 1 }
  0x9b   : > { %s2158_s30 = scalar_lea.vmem [#allocation7], %s1406_s27  ;;  %p1409_p1 = scmp.ne.s32.totalorder %s1826_s20, 0 }
  0x9c   : > { %s568_s26 = scalar_lea.vmem %s2295_s2, %s2130_s25  ;;  %s571_s24 = scalar_lea.vmem %s2297_s4, %s2130_s25  ;;  %v599_v0 = vld [vmem:[#allocation2] sm:$0xff] (!%p1409_p1)  ;;  %v600_v1 = vld [vmem:[#allocation2 + $0x8] sm:$0xff] (!%p1409_p1)  ;;  %v1844_v2 = vmov (!%p1409_p1), 0.0  }
  0x9d   : > { %s1408_s15 = sshll.u32 %s2130_s25, 1  ;;  %598 = sbr.rel (%p1409_p1) target bundleno = 167 (0xa7), region = 80 }
  0x9e   : > { %s574_s29 = scalar_lea.vmem %s2356_s28, %s2130_s25  ;;  %s2359_s14 = sld [smem:[#allocation19_spill]] (!%p1409_p1) }
  0x9f   : > { %s581_s16 = scalar_lea.vmem %s2357_s12, %s2130_s25  ;;  %s2156_s23 = scalar_lea.vmem %s2358_s13, %s1408_s15 }
  0xa0   : > { %s2360_s15 = sld [smem:[#allocation20_spill]] (!%p1409_p1) }
  0xa4   : > { %601 = vst [vmem:[%s2359_s14] sm:$0xff] %v599_v0  ;;  %602 = vst [vmem:[%s2359_s14 + $0x8] sm:$0xff] %v600_v1 }
  0xa6   : > { %603 = vst [vmem:[%s2360_s15] sm:$0xff] %v1844_v2  ;;  %604 = vst [vmem:[%s2360_s15 + $0x8] sm:$0xff] %v1844_v2 }
  0xa7 PF: > { %s2361_s0 = sld [smem:[#allocation19_spill]]  ;;  %v1580_v5 = vld [vmem:[#allocation4 + $0x4] ss:$8 sps:$4 sm:$0xff]   ;;  %v1582_v6 = vld [vmem:[#allocation4] ss:$8 sps:$4 sm:$0xff]   ;;  %v1845_v24 = vmov 0   ;;  %s2362_s14 = scalar_lea.vmem %s2294_s1, %s2130_s25 }
  0xa8   : > { %v1583_v7 = vld [vmem:[#allocation4 + $0x14] ss:$8 sps:$4 sm:$0xff]   ;;  %747 = vmatprep.subr.bf16.mxu0 %v1580_v5  ;;  %v1585_v16 = vld [vmem:[#allocation4 + $0x10] ss:$8 sps:$4 sm:$0xff]   ;;  %v1586_v17 = vld [vmem:[#allocation4 + $0x24] ss:$8 sps:$4 sm:$0xff]   ;;  %779 = vmatprep.mubr.bf16.mxu0 %v1845_v24 }
  0xa9   : > { %748 = vmatpush1.bf16.msra.mxu0 %v1582_v6  ;;  %v1588_v18 = vld [vmem:[#allocation4 + $0x20] ss:$8 sps:$4 sm:$0xff]   ;;  %v1589_v19 = vld [vmem:[#allocation4 + $0x34] ss:$8 sps:$4 sm:$0xff]   ;;  %v1591_v20 = vld [vmem:[#allocation4 + $0x30] ss:$8 sps:$4 sm:$0xff]   ;;  %975 = vmatprep.mubr.bf16.mxu1 %v1845_v24 }
  0xaa   : > { %749 = vmatprep.subr.bf16.mxu0 %v1583_v7  ;;  %v1592_v21 = vld [vmem:[#allocation4 + $0x44] ss:$8 sps:$4 sm:$0xff]   ;;  %v1594_v22 = vld [vmem:[#allocation4 + $0x40] ss:$8 sps:$4 sm:$0xff]   ;;  %v1595_v23 = vld [vmem:[#allocation4 + $0x54] ss:$8 sps:$4 sm:$0xff]  }
  0xab   : > { %v1597_v25 = vld [vmem:[#allocation4 + $0x50] ss:$8 sps:$4 sm:$0xff]   ;;  %v1598_v26 = vld [vmem:[#allocation4 + $0x64] ss:$8 sps:$4 sm:$0xff]   ;;  %v1600_v27 = vld [vmem:[#allocation4 + $0x60] ss:$8 sps:$4 sm:$0xff]  }
  0xac   : > { %v1601_v28 = vld [vmem:[#allocation4 + $0x74] ss:$8 sps:$4 sm:$0xff]   ;;  %v1603_v29 = vld [vmem:[#allocation4 + $0x70] ss:$8 sps:$4 sm:$0xff]   ;;  %s2363_s15 = sld [smem:[#allocation20_spill]] }
  0xad   : > { %v2176_v3 = vld [vmem:[%s2361_s0] sm:$0xff]  ;;  %v2181_v4 = vld [vmem:[%s2361_s0 + $0x8] sm:$0xff]  ;;  %750 = vmatpush1.bf16.msra.mxu0 %v1585_v16  ;;  %v1604_v57 = vld [vmem:[%s2122_s6 + $0x4] ss:$8 sps:$4 sm:$0xff]  }
  0xae   : > { %611 = vadd.xlane.f32.xlu0 %v2176_v3  ;;  %751 = vmatprep.subr.bf16.mxu0 %v1586_v17  ;;  %v1410_v38 = vld [vmem:[%s2362_s14] ss:$0 sm:$0xff]  ;;  %v1606_v58 = vld [vmem:[%s2122_s6] ss:$8 sps:$4 sm:$0xff]   ;;  %v1607_v59 = vld [vmem:[%s2122_s6 + $0x14] ss:$8 sps:$4 sm:$0xff]  }
  0xaf   : > { %v1411_v42 = vld [vmem:[%s568_s26] ss:$0 sm:$0xff]  ;;  %943 = vmatprep.subr.bf16.mxu1 %v1604_v57  ;;  %v1610_v5 = vld [vmem:[%s2122_s6 + $0x24] ss:$8 sps:$4 sm:$0xff]   ;;  %v1612_v6 = vld [vmem:[%s2122_s6 + $0x20] ss:$8 sps:$4 sm:$0xff]  }
  0xb0   : > { %944 = vmatpush1.bf16.msra.mxu1 %v1606_v58  ;;  %v1609_v60 = vld [vmem:[%s2122_s6 + $0x10] ss:$8 sps:$4 sm:$0xff]   ;;  %v1613_v7 = vld [vmem:[%s2122_s6 + $0x34] ss:$8 sps:$4 sm:$0xff]   ;;  %v1628_v17 = vld [vmem:[%s2158_s30 + $0x40] sm:$0xff]  }
  0xb1   : > { %752 = vmatpush1.bf16.msra.mxu0 %v1588_v18  ;;  %945 = vmatprep.subr.bf16.mxu1 %v1607_v59  ;;  %v1627_v16 = vld [vmem:[%s2122_s6 + $0x70] ss:$8 sps:$4 sm:$0xff]   ;;  %v1629_v18 = vld [vmem:[%s2158_s30] sm:$0xff]  }
  0xb2   : > { %613 = vadd.xlane.f32.xlu0 %v2181_v4  ;;  %753 = vmatprep.subr.bf16.mxu0 %v1589_v19  ;;  %v607_v47 = vld [vmem:[%s2363_s15] sm:$0xff]  ;;  %v608_v51 = vld [vmem:[%s2363_s15 + $0x8] sm:$0xff]  ;;  %v1630_v19 = vld [vmem:[%s2158_s30 + $0x48] sm:$0xff]  }
  0xb4   : > { %946 = vmatpush1.bf16.msra.mxu1 %v1609_v60 }
  0xb5   : > { %754 = vmatpush1.bf16.msra.mxu0 %v1591_v20  ;;  %947 = vmatprep.subr.bf16.mxu1 %v1610_v5  ;;  %v1631_v20 = vld [vmem:[%s2158_s30 + $0x8] sm:$0xff]  }
  0xb6   : > { %755 = vmatprep.subr.bf16.mxu0 %v1592_v21 }
  0xb8   : > { %948 = vmatpush1.bf16.msra.mxu1 %v1612_v6 }
  0xb9   : > { %756 = vmatpush1.bf16.msra.mxu0 %v1594_v22  ;;  %949 = vmatprep.subr.bf16.mxu1 %v1613_v7 }
  0xba   : > { %757 = vmatprep.subr.bf16.mxu0 %v1595_v23 }
  0xbd   : > { %758 = vmatpush1.bf16.msra.mxu0 %v1597_v25 }
  0xbe   : > { %759 = vmatprep.subr.bf16.mxu0 %v1598_v26 }
  0xc1   : > { %760 = vmatpush1.bf16.msra.mxu0 %v1600_v27 }
  0xc2   : > { %761 = vmatprep.subr.bf16.mxu0 %v1601_v28  ;;  %v1428_v28 = vld [vmem:[%s571_s24] ss:$0 sm:$0xff] }
  0xc5   : > { %762 = vmatpush1.bf16.msra.mxu0 %v1603_v29 }
  0xc6   : > { %1471 = vmatprep.subr.bf16.mxu0 %v1628_v17 }
 0x13b   : > { %v612_v8 = vpop.xlane.xlu0 %611 }
 0x13c   : > { %v616_v9 = vmul.f32 0.0078125, %v612_v8  ;;  %v1615_v8 = vld [vmem:[%s2122_s6 + $0x30] ss:$8 sps:$4 sm:$0xff]  }
 0x13d   : > { %950 = vmatpush1.bf16.msra.mxu1 %v1615_v8 }
 0x13e   : > { %v618_v10 = vsub.f32 %v2176_v3, %v616_v9  ;;  %v1616_v9 = vld [vmem:[%s2122_s6 + $0x44] ss:$8 sps:$4 sm:$0xff]  }
 0x13f   : > { %v614_v11 = vpop.xlane.xlu0 %613  ;;  %951 = vmatprep.subr.bf16.mxu1 %v1616_v9 }
 0x140   : > { %v617_v12 = vmul.f32 0.0078125, %v614_v11  ;;  %v620_v13 = vmul.f32 %v618_v10, %v618_v10  ;;  %v1619_v11 = vld [vmem:[%s2122_s6 + $0x54] ss:$8 sps:$4 sm:$0xff]  }
 0x142   : > { %v619_v14 = vsub.f32 %v2181_v4, %v617_v12  ;;  %622 = vadd.xlane.f32.xlu1 %v620_v13  ;;  %v1621_v12 = vld [vmem:[%s2122_s6 + $0x50] ss:$8 sps:$4 sm:$0xff]   ;;  %v1622_v13 = vld [vmem:[%s2122_s6 + $0x64] ss:$8 sps:$4 sm:$0xff]  }
 0x144   : > { %v621_v15 = vmul.f32 %v619_v14, %v619_v14 }
 0x146   : > { %624 = vadd.xlane.f32.xlu1 %v621_v15  ;;  %v1625_v15 = vld [vmem:[%s2122_s6 + $0x74] ss:$8 sps:$4 sm:$0xff]  }
 0x1cf   : > { %v623_v30 = vpop.xlane.xlu1 %622 }
 0x1d0   : > { %v626_v31 = vmul.f32 0.0078125, %v623_v30 }
 0x1d2   : > { %v628_v32 = vadd.f32 1e-05, %v626_v31 }
 0x1d3   : > { %v625_v33 = vpop.xlane.xlu1 %624 }
 0x1d4   : > { %1644 = vrsqrt.f32 %v628_v32  ;;  %v627_v34 = vmul.f32 0.0078125, %v625_v33  ;;  %v1429_v33 = vld [vmem:[%s574_s29] ss:$0 sm:$0xff] }
 0x1d6   : > { %v629_v35 = vadd.f32 1e-05, %v627_v34 }
 0x1d8   : > { %1646 = vrsqrt.f32 %v629_v35 }
 0x1de   : > { %v1645_v36 = vpop.eup %1644 }
 0x1df   : > { %v632_v37 = vmul.f32 %v1645_v36, %v618_v10  ;;  %v1618_v10 = vld [vmem:[%s2122_s6 + $0x40] ss:$8 sps:$4 sm:$0xff]  }
 0x1e0   : > { %952 = vmatpush1.bf16.msra.mxu1 %v1618_v10 }
 0x1e1   : > { %v640_v41 = vmul.f32 %v1410_v38, %v632_v37  ;;  %953 = vmatprep.subr.bf16.mxu1 %v1619_v11 }
 0x1e2   : > { %v1647_v39 = vpop.eup %1646 }
 0x1e3   : > { %v633_v40 = vmul.f32 %v1647_v39, %v619_v14  ;;  %v648_v44 = vadd.f32 %v1411_v42, %v640_v41  ;;  %v1624_v14 = vld [vmem:[%s2122_s6 + $0x60] ss:$8 sps:$4 sm:$0xff]   ;;  %v1633_v39 = vld [vmem:[%s2158_s30 + $0x10] sm:$0xff]   ;;  %v1635_v41 = vld [vmem:[%s2158_s30 + $0x18] sm:$0xff]  }
 0x1e4   : > { %954 = vmatpush1.bf16.msra.mxu1 %v1621_v12 }
 0x1e5   : > { %v641_v43 = vmul.f32 %v1410_v38, %v633_v40  ;;  %955 = vmatprep.subr.bf16.mxu1 %v1622_v13  ;;  %v1632_v38 = vld [vmem:[%s2158_s30 + $0x50] sm:$0xff]   ;;  %v1634_v40 = vld [vmem:[%s2158_s30 + $0x58] sm:$0xff]  }
 0x1e7   : > { %v649_v45 = vadd.f32 %v1411_v42, %v641_v43  ;;  %v1636_v42 = vld [vmem:[%s2158_s30 + $0x60] sm:$0xff]  }
 0x1e8   : > { %956 = vmatpush1.bf16.msra.mxu1 %v1624_v14  ;;  %v1637_v43 = vld [vmem:[%s2158_s30 + $0x20] sm:$0xff]  }
 0x1e9   : > { %v650_v46 = vpack.c.bf16 %v649_v45, %v648_v44  ;;  %957 = vmatprep.subr.bf16.mxu1 %v1625_v15  ;;  %v1638_v44 = vld [vmem:[%s2158_s30 + $0x68] sm:$0xff]  }
 0x1ea   : > { %v1639_v45 = vld [vmem:[%s2158_s30 + $0x28] sm:$0xff]  }
 0x1eb   : > { %780 = vmatmul.mubr.bf16.vlgmr.msra.gmra.mrb[0].mxu0 %v650_v46  ;;  %v1640_v46 = vld [vmem:[%s2158_s30 + $0x70] sm:$0xff]  }
 0x1ec   : > { %958 = vmatpush1.bf16.msra.mxu1 %v1627_v16  ;;  %1472 = vmatpush3.bf16.msra.mxu0 %v1629_v18 }
 0x1ed   : > { %1473 = vmatprep.subr.bf16.mxu0 %v1630_v19 }
 0x1f0   : > { %1474 = vmatpush3.bf16.msra.mxu0 %v1631_v20 }
 0x1f1   : > { %1475 = vmatprep.subr.bf16.mxu0 %v1632_v38 }
 0x1f4   : > { %1476 = vmatpush3.bf16.msra.mxu0 %v1633_v39 }
 0x1f5   : > { %1477 = vmatprep.subr.bf16.mxu0 %v1634_v40 }
 0x1f8   : > { %1478 = vmatpush3.bf16.msra.mxu0 %v1635_v41 }
 0x1f9   : > { %1479 = vmatprep.subr.bf16.mxu0 %v1636_v42 }
 0x1fc   : > { %1480 = vmatpush3.bf16.msra.mxu0 %v1637_v43 }
 0x1fd   : > { %1481 = vmatprep.subr.bf16.mxu0 %v1638_v44 }
 0x200   : > { %1482 = vmatpush3.bf16.msra.mxu0 %v1639_v45 }
 0x201   : > { %1483 = vmatprep.subr.bf16.mxu0 %v1640_v46 }
 0x2be   : > { %v781_v48 = vpop.f32.mrb[0].mxu0 }
 0x2bf   : > { %v2201_v49 = vadd.f32 %v781_v48, %v2176_v3  ;;  %v783_v50 = vpop.f32.mrb[1].mxu0  ;;  %v1642_v48 = vld [vmem:[%s2158_s30 + $0x78] sm:$0xff]  }
 0x2c0   : > { %v792_v52 = vadd.f32 %v783_v50, %v607_v47  ;;  %v785_v53 = vpop.f32.mrb[2].mxu0  ;;  %v1641_v47 = vld [vmem:[%s2158_s30 + $0x30] sm:$0xff]   ;;  %v1643_v50 = vld [vmem:[%s2158_s30 + $0x38] sm:$0xff]  }
 0x2c1   : > { %v2207_v54 = vadd.f32 %v785_v53, %v2181_v4  ;;  %796 = vadd.xlane.f32.xlu0 %v2201_v49  ;;  %v787_v55 = vpop.f32.mrb[3].mxu0  ;;  %1484 = vmatpush3.bf16.msra.mxu0 %v1641_v47 }
 0x2c2   : > { %1188 = vst [vmem:[%s2363_s15] sm:$0xff] %v792_v52  ;;  %v793_v56 = vadd.f32 %v787_v55, %v608_v51  ;;  %1485 = vmatprep.subr.bf16.mxu0 %v1642_v48  ;;  %v853_v51 = vlaneseq  ;;  %v851_v55 = vld [vmem:[%s2156_s23] sm:$0x3] }
 0x2c3   : > { %798 = vadd.xlane.f32.xlu1 %v2207_v54 }
 0x2c4   : > { %1189 = vst [vmem:[%s2363_s15 + $0x8] sm:$0xff] %v793_v56  ;;  %v854_v52 = vshrl.u32 %v853_v51, 7 }
 0x2c5   : > { %1486 = vmatpush3.bf16.msra.mxu0 %v1643_v50 }
 0x2c6   : > { %v855_v53 = vsub.s32 0, %v854_v52  ;;  %v859_v56 = vsub.s32 1, %v854_v52 }
 0x2c8   : > { %v856_v57 = vrot.slane %v851_v55, %v855_v53  ;;  %v860_v58 = vrot.slane %v851_v55, %v859_v56 }
 0x34e   : > { %v797_v61 = vpop.xlane.xlu0 %796 }
 0x34f   : > { %v800_v62 = vmul.f32 0.0078125, %v797_v61 }
 0x350   : > { %v799_v63 = vpop.xlane.xlu1 %798 }
 0x351   : > { %v802_v0 = vsub.f32 %v2201_v49, %v800_v62  ;;  %v801_v1 = vmul.f32 0.0078125, %v799_v63 }
 0x353   : > { %v803_v2 = vsub.f32 %v2207_v54, %v801_v1  ;;  %v804_v3 = vmul.f32 %v802_v0, %v802_v0 }
 0x355   : > { %806 = vadd.xlane.f32.xlu0 %v804_v3  ;;  %v805_v4 = vmul.f32 %v803_v2, %v803_v2 }
 0x357   : > { %808 = vadd.xlane.f32.xlu1 %v805_v4 }
 0x3e2   : > { %v807_v21 = vpop.xlane.xlu0 %806 }
 0x3e3   : > { %v810_v22 = vmul.f32 0.0078125, %v807_v21 }
 0x3e4   : > { %v809_v23 = vpop.xlane.xlu1 %808 }
 0x3e5   : > { %v812_v24 = vadd.f32 1e-05, %v810_v22  ;;  %v811_v25 = vmul.f32 0.0078125, %v809_v23 }
 0x3e7   : > { %1648 = vrsqrt.f32 %v812_v24  ;;  %v813_v26 = vadd.f32 1e-05, %v811_v25 }
 0x3e9   : > { %1650 = vrsqrt.f32 %v813_v26  ;;  %v1446_v26 = vld [vmem:[%s581_s16] ss:$0 sm:$0xff] }
 0x3f1   : > { %v1649_v27 = vpop.eup %1648 }
 0x3f2   : > { %v816_v29 = vmul.f32 %v1649_v27, %v802_v0 }
 0x3f3   : > { %v1651_v30 = vpop.eup %1650 }
 0x3f4   : > { %v817_v31 = vmul.f32 %v1651_v30, %v803_v2  ;;  %v824_v32 = vmul.f32 %v1428_v28, %v816_v29 }
 0x3f6   : > { %v825_v34 = vmul.f32 %v1428_v28, %v817_v31  ;;  %v832_v35 = vadd.f32 %v1429_v33, %v824_v32 }
 0x3f8   : > { %v833_v36 = vadd.f32 %v1429_v33, %v825_v34 }
 0x3fa   : > { %v834_v37 = vpack.c.bf16 %v833_v36, %v832_v35 }
 0x3fc   : > { %976 = vmatmul.mubr.bf16.vlgmr.msra.gmra.mrb[0].mxu1 %v834_v37 }
 0x4cf   : > { %v977_v59 = vpop.f32.mrb[0].mxu1 }
 0x4d0   : > { %v978_v60 = vadd.f32 %v977_v59, %v856_v57  ;;  %v979_v61 = vpop.f32.mrb[1].mxu1 }
 0x4d1   : > { %v980_v62 = vadd.f32 %v979_v61, %v860_v58  ;;  %v981_v63 = vpop.f32.mrb[2].mxu1 }
 0x4d2   : > { %v990_v0 = vmul.f32 0.70710677, %v978_v60  ;;  %v982_v1 = vadd.f32 %v981_v63, %v856_v57  ;;  %v983_v2 = vpop.f32.mrb[3].mxu1  ;;  %v986_v13 = vmul.f32 0.5, %v978_v60 }
 0x4d3   : > { %v991_v3 = vmul.f32 0.70710677, %v980_v62  ;;  %v984_v4 = vadd.f32 %v983_v2, %v860_v58  ;;  %v987_v16 = vmul.f32 0.5, %v980_v62 }
 0x4d4   : > { %1652 = verf.f32 %v990_v0  ;;  %v992_v5 = vmul.f32 0.70710677, %v982_v1  ;;  %v988_v14 = vmul.f32 0.5, %v982_v1 }
 0x4d5   : > { %1654 = verf.f32 %v991_v3  ;;  %v993_v6 = vmul.f32 0.70710677, %v984_v4  ;;  %v989_v17 = vmul.f32 0.5, %v984_v4 }
 0x4d6   : > { %1656 = verf.f32 %v992_v5 }
 0x4d7   : > { %1658 = verf.f32 %v993_v6 }
 0x4de   : > { %v1653_v7 = vpop.eup %1652 }
 0x4df   : > { %v1655_v8 = vpop.eup %1654  ;;  %v998_v9 = vadd.f32 1.0, %v1653_v7 }
 0x4e0   : > { %v1657_v10 = vpop.eup %1656  ;;  %v999_v11 = vadd.f32 1.0, %v1655_v8 }
 0x4e1   : > { %v1659_v12 = vpop.eup %1658  ;;  %v1000_v15 = vadd.f32 1.0, %v1657_v10  ;;  %v1002_v19 = vmul.f32 %v998_v9, %v986_v13 }
 0x4e2   : > { %v1001_v18 = vadd.f32 1.0, %v1659_v12  ;;  %v1003_v21 = vmul.f32 %v999_v11, %v987_v16 }
 0x4e3   : > { %v1004_v20 = vmul.f32 %v1000_v15, %v988_v14 }
 0x4e4   : > { %v1005_v22 = vmul.f32 %v1001_v18, %v989_v17 }
 0x4e5   : > { %v1006_v23 = vpack.c.bf16 %v1004_v20, %v1002_v19 }
 0x4e6   : > { %v1007_v24 = vpack.c.bf16 %v1005_v22, %v1003_v21 }
 0x4e8   : > { %1175 = vmatprep.mubr.bf16.mxu0 %v1007_v24 }
 0x4e9   : > { %1176 = vmatmul.mubr.bf16.vlgmr.msra.gmra.mrb[4].mxu0 %v1006_v23 }
 0x5bc   : > { %v1487_v25 = vpop.f32.mrb[4].mxu0 }
 0x5bd   : > { %v1488_v27 = vpop.f32.mrb[5].mxu0 }
 0x5be   : > { %v1489_v28 = vadd.f32 %v1488_v27, %v1487_v25  ;;  %v1490_v29 = vpop.f32.mrb[6].mxu0 }
 0x5bf   : > { %v1491_v30 = vpop.f32.mrb[7].mxu0 }
 0x5c0   : > { %v1178_v31 = vadd.f32 %v1489_v28, %v1446_v26  ;;  %v1492_v32 = vadd.f32 %v1491_v30, %v1490_v29 }
 0x5c2   : > { %v1184_v33 = vadd.f32 %v1178_v31, %v2201_v49  ;;  %v1181_v34 = vadd.f32 %v1492_v32, %v1446_v26 }
 0x5c4   : > { %1186 = vst [vmem:[%s2361_s0] sm:$0xff] %v1184_v33  ;;  %v1185_v35 = vadd.f32 %v1181_v34, %v2207_v54 }
 0x5c6   : > { %1187 = vst [vmem:[%s2361_s0 + $0x8] sm:$0xff] %v1185_v35 }
 0x5c7 PF: > { %s24_s22 = sadd.s32 1, %s1834_s22   ;;  %s2366_s25 = sld [smem:[#allocation11_spill]] }
 0x5c8   : > { %p21_p4 = scmp.ge.s32.totalorder %s24_s22, 4   ;;  %s2367_s19 = sld [smem:[#allocation13_spill]] }
 0x5c9   : > { %s2368_s16 = sld [smem:[#allocation12_spill]]  ;;  %s2369_s17 = smov %s1818_s18 }
 0x5ca   : > { %s2371_s20 = smov %s1830_s21  ;;  %23 = sbr.rel (!%p21_p4) target bundleno = 12 (0xc), region = 153 }
 0x5cd   : > { %s2370_s18 = smov %s2366_s25 }
 0x5cf   : > { %s2372_s21 = smov %s2368_s16 }
 0x5d1   :  { %1229 = vsyncpa [#allocation3], 1 }
 0x5d2   :  { %1231 = vsyncpa [#allocation3 + $0x1], 1 }
 0x5d3   :  { %1232 = vsyncpa [#allocation5], 1 }

</bundles_post_ra>
